<compile_context>
chip_gen: v7x
topology: tpu7x:2x2x1
jax: 0.10.0
libtpu: 0.0.40
codegen_flags: <defaults>
</compile_context>

<pallas_src>
import functools

import jax
import jax.numpy as jnp
from jax import lax
from jax.experimental import pallas as pl
from jax.experimental.pallas import tpu as pltpu


_INTERMEDIATE_BUDGET_BYTES = 16 * 1024 * 1024   # cap on the 3x (tn, tq) f32 slabs


def _round_up(a: int, b: int) -> int:
    return ((a + b - 1) // b) * b


def _vq_kernel(x_ref, w_ref, wsqh_ref, idx_ref, min_sc, arg_sc, *, num_q, tile_q):
    j = pl.program_id(1)

    @pl.when(j == 0)
    def _init():
        min_sc[...] = jnp.full_like(min_sc, jnp.inf)
        arg_sc[...] = jnp.zeros_like(arg_sc)

    # scores[n, q] = 0.5*||w_q||^2 - <x_n, w_q>   (argmin-equivalent to squared dist).
    # Operands stay in their input dtype; only the accumulator is f32.  Contract E
    # with E directly -> no materialized transpose of the codebook tile.
    xw = lax.dot_general(
        x_ref[...], w_ref[...],
        dimension_numbers=(((1,), (1,)), ((), ())),
        preferred_element_type=jnp.float32,
    )                                                        # (tn, tq) f32
    scores = wsqh_ref[...] - xw                              # (1, tq) bcast - (tn, tq)

    if num_q % tile_q != 0:
        # Mask codebook rows that fall in the padded tail of the last Q tile.
        q_global = j * tile_q + lax.broadcasted_iota(jnp.int32, scores.shape, 1)
        scores = jnp.where(q_global < num_q, scores, jnp.inf)

    local_min = jnp.min(scores, axis=-1, keepdims=True)                      # (tn, 1)
    local_arg = (jnp.argmin(scores, axis=-1).astype(jnp.int32)[:, None]
                 + j * tile_q)                                               # (tn, 1)

    # Running min / argmin across Q tiles (strict '<' keeps the lowest index on ties,
    # matching torch.argmin tie-breaking).
    better = local_min < min_sc[...]
    arg_sc[...] = jnp.where(better, local_arg, arg_sc[...])
    min_sc[...] = jnp.minimum(local_min, min_sc[...])

    @pl.when(j == pl.num_programs(1) - 1)
    def _emit():
        # One sublane->lane relayout per row tile (amortized over all Q steps),
        # then a full-lane (1, tn) store.
        idx_ref[0] = arg_sc[...].T


@functools.partial(jax.jit, static_argnames=("tile_n", "tile_q"))
def quantize(x, weight, tile_n=512, tile_q=2048):
    """x: (*, E), weight: (Q, E).
    Returns (quantized: (*, E) in weight dtype, quantized_idx: (*,) int32)."""
    input_shape = x.shape
    Q, E = weight.shape

    compute_dtype = jnp.promote_types(x.dtype, weight.dtype)
    x_flat = x.reshape(-1, E).astype(compute_dtype)
    w_c = weight.astype(compute_dtype)
    N = x_flat.shape[0]

    # Hoist 0.5*||w_q||^2 out of the kernel (computed once in f32, tiny (1, Q) input).
    w_f32 = weight.astype(jnp.float32)
    w_sq_half = (0.5 * jnp.sum(w_f32 * w_f32, axis=-1))[None, :]            # (1, Q)

    # Lane density: zero-pad E to a multiple of 128 once (full-lane x loads, full MXU
    # contraction depth; zeros do not change any distance).
    E_pad = _round_up(E, 128)
    if E_pad != E:
        x_flat = jnp.pad(x_flat, ((0, 0), (0, E_pad - E)))
        w_c = jnp.pad(w_c, ((0, 0), (0, E_pad - E)))

    # Q tiling: small codebooks stay resident as a single tile; large ones are split
    # into lane-aligned tiles iterated on a trailing "arbitrary" grid axis.
    if Q <= tile_q:
        tq = Q
    else:
        tq = max(128, (int(tile_q) // 128) * 128)
    num_q_tiles = pl.cdiv(Q, tq)

    # Row tile: multiple of 8, capped by the intermediate budget, and split so v7x's
    # two TensorCores both get work whenever there is more than one vreg-row of data.
    tn = max(8, _round_up(min(int(tile_n), _round_up(N, 8)), 8))
    while tn > 64 and 3 * tn * tq * 4 > _INTERMEDIATE_BUDGET_BYTES:
        tn = _round_up(tn // 2, 8)
    if N > 8 and pl.cdiv(N, tn) < 2:
        tn = max(8, _round_up(pl.cdiv(N, 2), 8))
    num_n_tiles = pl.cdiv(N, tn)

    # Explicit VMEM budget: double-buffered x / codebook tiles + small operands +
    # running-min scratch + the (tn, tq) f32 intermediates, with margin.
    itemsize = jnp.dtype(compute_dtype).itemsize
    vmem_bytes = (
        2 * tn * E_pad * itemsize        # x row tile (double-buffered)
        + 2 * tq * E_pad * itemsize      # codebook tile (double-buffered)
        + 2 * tq * 4                     # 0.5*||w||^2 tile
        + 2 * tn * 4                     # index output tile
        + 2 * tn * 128 * 4               # running min / argmin scratch (lane-padded)
        + 3 * tn * tq * 4                # xw / scores / select intermediates
    )
    vmem_limit = int(min(max(2 * vmem_bytes, 16 * 1024 * 1024), 64 * 1024 * 1024))

    kernel = functools.partial(_vq_kernel, num_q=Q, tile_q=tq)

    idx_tiles = pl.pallas_call(
        kernel,
        out_shape=jax.ShapeDtypeStruct((num_n_tiles, 1, tn), jnp.int32),
        grid_spec=pltpu.PrefetchScalarGridSpec(
            num_scalar_prefetch=0,
            grid=(num_n_tiles, num_q_tiles),
            in_specs=[
                pl.BlockSpec((tn, E_pad), lambda i, j: (i, 0)),   # x row tile
                pl.BlockSpec((tq, E_pad), lambda i, j: (j, 0)),   # codebook Q tile
                pl.BlockSpec((1, tq), lambda i, j: (0, j)),       # 0.5*||w||^2 tile
            ],
            out_specs=pl.BlockSpec((1, 1, tn), lambda i, j: (i, 0, 0)),  # lane-dense idx
            scratch_shapes=[
                pltpu.VMEM((tn, 1), jnp.float32),   # running min
                pltpu.VMEM((tn, 1), jnp.int32),     # running argmin
            ],
        ),
        compiler_params=pltpu.CompilerParams(
            dimension_semantics=("parallel", "arbitrary"),
            vmem_limit_bytes=vmem_limit,
        ),
    )(x_flat, w_c, w_sq_half)

    q_idx = idx_tiles.reshape(-1)[:N].reshape(input_shape[:-1])
    # Gather in the wrapper: exact, in the codebook dtype (matches weight[q_idx]).
    q_data = weight[q_idx]
    return q_data, q_idx


def quantize_ref(x, weight):
    """Pure-JAX reference matching the PyTorch forward exactly."""
    input_shape = x.shape
    E = weight.shape[-1]
    xf = x.reshape(-1, E)
    delta = weight[None, :, :] - xf[:, None, :]
    dist = jnp.sum(delta * delta, axis=-1)
    q_idx = jnp.argmin(dist, axis=-1)
    q_data = weight[q_idx]
    return q_data.reshape(input_shape), q_idx.reshape(input_shape[:-1])


if __name__ == "__main__":
    key = jax.random.PRNGKey(0)
    k_w, k_x = jax.random.split(key)

    # Module config (small): Q codebook entries of dimension E.
    Q = 256          # num_quantizing (num_data // 4 in the reference script)
    E = 32           # quantizing_dim

    # nn.init.normal_(weight, mean=0.0, std=0.001), deterministic here.
    weight = (0.001 * jax.random.normal(k_w, (Q, E))).astype(jnp.float32)

    # x: (*, E) with small leading dims.
    x = (0.001 * jax.random.normal(k_x, (2, 4, E))).astype(jnp.float32)

    q_data, q_idx = quantize(x, weight)
    q_data = jax.block_until_ready(q_data)
    q_idx = jax.block_until_ready(q_idx)

    # Correctness check against pure-JAX reference.
    q_data_ref, q_idx_ref = quantize_ref(x, weight)
    assert q_data.shape == x.shape and q_idx.shape == x.shape[:-1]
    assert bool(jnp.all(q_idx == q_idx_ref)), "argmin index mismatch"
    assert bool(jnp.allclose(q_data, q_data_ref, atol=1e-6)), "quantized data mismatch"

    print("KERNEL_OK")
</pallas_src>

<mosaic_0001>
module attributes {stable_mosaic.version = 11 : i64} {
  func.func @_vq_kernel(%arg0: i32, %arg1: i32, %arg2: memref<8x128xf32, #tpu.memory_space<vmem>>, %arg3: memref<256x128xf32, #tpu.memory_space<vmem>>, %arg4: memref<1x256xf32, #tpu.memory_space<vmem>>, %arg5: memref<1x1x8xi32, #tpu.memory_space<vmem>>, %arg6: memref<8x1xf32, #tpu.memory_space<vmem>>, %arg7: memref<8x1xi32, #tpu.memory_space<vmem>>) attributes {dimension_semantics = [#tpu.dimension_semantics<parallel>, #tpu.dimension_semantics<arbitrary>], iteration_bounds = array<i64: 1, 1>, scalar_prefetch = 0 : i64, scratch_operands = 2 : i64, tpu.core_type = #tpu.core_type<tc>, window_params = [{transform_indices = @transform_0, window_bounds = array<i64: 8, 128>}, {transform_indices = @transform_1, window_bounds = array<i64: 256, 128>}, {transform_indices = @transform_2, window_bounds = array<i64: 1, 256>}, {transform_indices = @transform_3, window_bounds = array<i64: 1, 1, 8>}]} {
    %c0_i32 = arith.constant 0 : i32
    %0 = arith.cmpi eq, %arg1, %c0_i32 : i32
    %1 = arith.extui %0 : i1 to i32
    %c0_i32_0 = arith.constant 0 : i32
    %2 = arith.cmpi ne, %1, %c0_i32_0 : i32
    scf.if %2 {
      %cst_19 = arith.constant 0x7F800000 : f32
      %27 = vector.broadcast %cst_19 : f32 to vector<8x1xf32>
      %c0_20 = arith.constant 0 : index
      %c0_21 = arith.constant 0 : index
      %28 = vector.load %arg6[%c0_20, %c0_21] : memref<8x1xf32, #tpu.memory_space<vmem>>, vector<8x1xf32>
      tpu.vector_store %arg6[%c0_20, %c0_21], %27 {strides = array<i32>} : memref<8x1xf32, #tpu.memory_space<vmem>>, vector<8x1xf32>,
      %c0_i32_22 = arith.constant 0 : i32
      %29 = vector.broadcast %c0_i32_22 : i32 to vector<8x1xi32>
      %c0_23 = arith.constant 0 : index
      %c0_24 = arith.constant 0 : index
      %30 = vector.load %arg7[%c0_23, %c0_24] : memref<8x1xi32, #tpu.memory_space<vmem>>, vector<8x1xi32>
      tpu.vector_store %arg7[%c0_23, %c0_24], %29 {strides = array<i32>} : memref<8x1xi32, #tpu.memory_space<vmem>>, vector<8x1xi32>,
    } else {
    }
    %c0 = arith.constant 0 : index
    %c0_1 = arith.constant 0 : index
    %3 = vector.load %arg2[%c0, %c0_1] : memref<8x128xf32, #tpu.memory_space<vmem>>, vector<8x128xf32>
    %c0_2 = arith.constant 0 : index
    %c0_3 = arith.constant 0 : index
    %4 = vector.load %arg3[%c0_2, %c0_3] : memref<256x128xf32, #tpu.memory_space<vmem>>, vector<256x128xf32>
    %cst = arith.constant dense<0.000000e+00> : vector<8x256xf32>
    %5 = tpu.matmul %3, %4, %cst {dimension_numbers = #tpu.dot_dimension_numbers<[1], [1], [0], [0], [0, 0, 1, 0], [], []>} : vector<8x128xf32>, vector<256x128xf32>, vector<8x256xf32> -> vector<8x256xf32>
    %c0_4 = arith.constant 0 : index
    %c0_5 = arith.constant 0 : index
    %6 = vector.load %arg4[%c0_4, %c0_5] : memref<1x256xf32, #tpu.memory_space<vmem>>, vector<1x256xf32>
    %7 = vector.broadcast %6 : vector<1x256xf32> to vector<8x256xf32>
    %8 = arith.subf %7, %5 : vector<8x256xf32>
    %cst_6 = arith.constant dense<0x7F800000> : vector<8xf32>
    %9 = vector.multi_reduction <minimumf>, %8, %cst_6 [1] : vector<8x256xf32> to vector<8xf32>
    %10 = vector.shape_cast %9 : vector<8xf32> to vector<8x1xf32>
    %11 = tpu.reduce_index %8 {axis = 1 : i32, kind = #tpu.reduction_kind<arg_min>} : vector<8x256xf32> -> vector<8xi32>
    %12 = vector.shape_cast %11 : vector<8xi32> to vector<8x1xi32>
    %c256_i32 = arith.constant 256 : i32
    %13 = arith.muli %arg1, %c256_i32 : i32
    %14 = vector.broadcast %13 : i32 to vector<8x1xi32>
    %15 = arith.addi %12, %14 : vector<8x1xi32>
    %c0_7 = arith.constant 0 : index
    %c0_8 = arith.constant 0 : index
    %16 = vector.load %arg6[%c0_7, %c0_8] : memref<8x1xf32, #tpu.memory_space<vmem>>, vector<8x1xf32>
    %17 = arith.cmpf olt, %10, %16 : vector<8x1xf32>
    %c0_9 = arith.constant 0 : index
    %c0_10 = arith.constant 0 : index
    %18 = vector.load %arg7[%c0_9, %c0_10] : memref<8x1xi32, #tpu.memory_space<vmem>>, vector<8x1xi32>
    %19 = arith.select %17, %15, %18 : vector<8x1xi1>, vector<8x1xi32>
    %c0_11 = arith.constant 0 : index
    %c0_12 = arith.constant 0 : index
    %20 = vector.load %arg7[%c0_11, %c0_12] : memref<8x1xi32, #tpu.memory_space<vmem>>, vector<8x1xi32>
    tpu.vector_store %arg7[%c0_11, %c0_12], %19 {strides = array<i32>} : memref<8x1xi32, #tpu.memory_space<vmem>>, vector<8x1xi32>,
    %c0_13 = arith.constant 0 : index
    %c0_14 = arith.constant 0 : index
    %21 = vector.load %arg6[%c0_13, %c0_14] : memref<8x1xf32, #tpu.memory_space<vmem>>, vector<8x1xf32>
    %22 = arith.minimumf %10, %21 : vector<8x1xf32>
    %c0_15 = arith.constant 0 : index
    %c0_16 = arith.constant 0 : index
    %23 = vector.load %arg6[%c0_15, %c0_16] : memref<8x1xf32, #tpu.memory_space<vmem>>, vector<8x1xf32>
    tpu.vector_store %arg6[%c0_15, %c0_16], %22 {strides = array<i32>} : memref<8x1xf32, #tpu.memory_space<vmem>>, vector<8x1xf32>,
    %c0_i32_17 = arith.constant 0 : i32
    %24 = arith.cmpi eq, %arg1, %c0_i32_17 : i32
    %25 = arith.extui %24 : i1 to i32
    %c0_i32_18 = arith.constant 0 : i32
    %26 = arith.cmpi ne, %25, %c0_i32_18 : i32
    scf.if %26 {
      %c0_19 = arith.constant 0 : index
      %c0_20 = arith.constant 0 : index
      %27 = vector.load %arg7[%c0_19, %c0_20] : memref<8x1xi32, #tpu.memory_space<vmem>>, vector<8x1xi32>
      %28 = tpu.transpose %27, [1, 0] : vector<8x1xi32> -> vector<1x8xi32>
      %c0_21 = arith.constant 0 : index
      %c0_22 = arith.constant 0 : index
      %c0_23 = arith.constant 0 : index
      %29 = vector.load %arg5[%c0_21, %c0_22, %c0_23] : memref<1x1x8xi32, #tpu.memory_space<vmem>>, vector<1x1x8xi32>
      %30 = vector.shape_cast %29 : vector<1x1x8xi32> to vector<1x8xi32>
      %31 = vector.shape_cast %28 : vector<1x8xi32> to vector<1x1x8xi32>
      tpu.vector_store %arg5[%c0_21, %c0_22, %c0_23], %31 {strides = array<i32>} : memref<1x1x8xi32, #tpu.memory_space<vmem>>, vector<1x1x8xi32>,
    } else {
    }
    return
  }
  func.func @transform_0(%arg0: i32, %arg1: i32) -> (i32, i32) {
    %c0_i32 = arith.constant 0 : i32
    %c0_i32_0 = arith.constant 0 : i32
    return %arg0, %c0_i32 : i32, i32
  }
  func.func @transform_1(%arg0: i32, %arg1: i32) -> (i32, i32) {
    %c0_i32 = arith.constant 0 : i32
    %c0_i32_0 = arith.constant 0 : i32
    return %arg1, %c0_i32 : i32, i32
  }
  func.func @transform_2(%arg0: i32, %arg1: i32) -> (i32, i32) {
    %c0_i32 = arith.constant 0 : i32
    %c0_i32_0 = arith.constant 0 : i32
    return %c0_i32, %arg1 : i32, i32
  }
  func.func @transform_3(%arg0: i32, %arg1: i32) -> (i32, i32, i32) {
    %c0_i32 = arith.constant 0 : i32
    %c0_i32_0 = arith.constant 0 : i32
    %c0_i32_1 = arith.constant 0 : i32
    return %arg0, %c0_i32, %c0_i32_0 : i32, i32, i32
  }
}

</mosaic_0001>

<bundles_post_ra>
// kernel: quantize.1
= control target key start
LH: loop header
LB: loop body
LE: loop exit
PB: predicated region body
PF: predicated region fallthrough
CT: control target
= control target key end

     0   :  { %v127_v49 = vlaneseq  ;;  %vm18_vm1 = vcmask 7168   ;;  %vm201_vm3 = vcmask 57344   ;;  %s408_s1 = inlined_call_operand.vmem [shape: f32[256,128], index: 1, kind: input, shape index: {}]   ;;  %s409_s0 = inlined_call_operand.vmem [shape: f32[8,128], index: 0, kind: input, shape index: {}]   ;;  %s410_s2 = inlined_call_operand.vmem [shape: f32[1,256], index: 2, kind: input, shape index: {}]   ;;  %s411_s3 = inlined_call_operand.vmem [shape: s32[1,1,8], index: 3, kind: output, shape index: {}]  }
   0x1   :  { %v38_v0 = vld [vmem:[%s408_s1 + $0x80] sm:$0xff]  ;;  %v39_v1 = vld [vmem:[%s408_s1 + $0x88] sm:$0xff]  ;;  %v40_v5 = vld [vmem:[%s408_s1 + $0x90] sm:$0xff] }
   0x2   :  { %v22_v2 = vld [vmem:[%s408_s1] sm:$0xff]  ;;  %v241_v3 = vpack.c.bf16 %v39_v1, %v38_v0  ;;  %v23_v4 = vld [vmem:[%s408_s1 + $0x8] sm:$0xff]  ;;  %v41_v6 = vld [vmem:[%s408_s1 + $0x98] sm:$0xff]  ;;  %v128_v50 = vshrl.u32 %v127_v49, 7  ;;  %v143_v55 = vand.u32 127, %v127_v49  ;;  %v277_v1 = vmov inf  }
   0x3   :  { %v243_v7 = vpack.c.bf16 %v23_v4, %v22_v2  ;;  %v245_v8 = vpack.c.bf16 %v41_v6, %v40_v5  ;;  %v24_v9 = vld [vmem:[%s408_s1 + $0x10] sm:$0xff]  ;;  %v25_v10 = vld [vmem:[%s408_s1 + $0x18] sm:$0xff]  ;;  %v42_v11 = vld [vmem:[%s408_s1 + $0xa0] sm:$0xff]  ;;  %19 = vst.msk [vmem:[#allocation2] sm:$0xff] %vm18_vm1, %v277_v1  ;;  %v278_v2 = vmov 0  }
   0x4   :  { %242 = vmatprep.subr.bf16.mxu0 %v241_v3  ;;  %v43_v12 = vld [vmem:[%s408_s1 + $0xa8] sm:$0xff]  ;;  %v247_v13 = vpack.c.bf16 %v25_v10, %v24_v9  ;;  %v21_v15 = vld [vmem:[%s409_s0] sm:$0xff]  ;;  %v44_v18 = vld [vmem:[%s408_s1 + $0xb0] sm:$0xff]  ;;  %v129_v51 = vsub.s32 0, %v128_v50  ;;  %v133_v53 = vsub.s32 1, %v128_v50  ;;  %v144_v60 = vadd.s32 128, %v143_v55 }
   0x5   :  { %244 = vmatpush3.bf16.xpose.msra.mxu0 %v243_v7  ;;  %v249_v14 = vpack.c.bf16 %v43_v12, %v42_v11  ;;  %239 = vmatprep.mubr.f32.mxu0 %v21_v15  ;;  %v26_v16 = vld [vmem:[%s408_s1 + $0x20] sm:$0xff]  ;;  %v27_v17 = vld [vmem:[%s408_s1 + $0x28] sm:$0xff]  ;;  %v45_v19 = vld [vmem:[%s408_s1 + $0xb8] sm:$0xff]  ;;  %20 = vst.msk [vmem:[#allocation3] sm:$0xff] %vm18_vm1, %v278_v2 }
   0x6   :  { %246 = vmatprep.subr.bf16.mxu0 %v245_v8  ;;  %v251_v20 = vpack.c.bf16 %v27_v17, %v26_v16  ;;  %v253_v21 = vpack.c.bf16 %v45_v19, %v44_v18  ;;  %v28_v22 = vld [vmem:[%s408_s1 + $0x30] sm:$0xff]  ;;  %v29_v23 = vld [vmem:[%s408_s1 + $0x38] sm:$0xff]  ;;  %v46_v24 = vld [vmem:[%s408_s1 + $0xc0] sm:$0xff] }
   0x7   :  { %v47_v25 = vld [vmem:[%s408_s1 + $0xc8] sm:$0xff]  ;;  %v255_v26 = vpack.c.bf16 %v29_v23, %v28_v22  ;;  %v30_v28 = vld [vmem:[%s408_s1 + $0x40] sm:$0xff]  ;;  %v48_v30 = vld [vmem:[%s408_s1 + $0xd0] sm:$0xff] }
   0x8   :  { %v257_v27 = vpack.c.bf16 %v47_v25, %v46_v24  ;;  %v31_v29 = vld [vmem:[%s408_s1 + $0x48] sm:$0xff]  ;;  %v49_v31 = vld [vmem:[%s408_s1 + $0xd8] sm:$0xff]  ;;  %v32_v34 = vld [vmem:[%s408_s1 + $0x50] sm:$0xff] }
   0x9   :  { %v259_v32 = vpack.c.bf16 %v31_v29, %v30_v28  ;;  %v261_v33 = vpack.c.bf16 %v49_v31, %v48_v30  ;;  %v33_v35 = vld [vmem:[%s408_s1 + $0x58] sm:$0xff]  ;;  %v50_v36 = vld [vmem:[%s408_s1 + $0xe0] sm:$0xff]  ;;  %v51_v37 = vld [vmem:[%s408_s1 + $0xe8] sm:$0xff] }
   0xa   :  { %v263_v38 = vpack.c.bf16 %v33_v35, %v32_v34  ;;  %v265_v39 = vpack.c.bf16 %v51_v37, %v50_v36  ;;  %v34_v40 = vld [vmem:[%s408_s1 + $0x60] sm:$0xff]  ;;  %v35_v41 = vld [vmem:[%s408_s1 + $0x68] sm:$0xff]  ;;  %v52_v42 = vld [vmem:[%s408_s1 + $0xf0] sm:$0xff] }
   0xb   :  { %v53_v43 = vld [vmem:[%s408_s1 + $0xf8] sm:$0xff]  ;;  %v267_v44 = vpack.c.bf16 %v35_v41, %v34_v40  ;;  %v36_v46 = vld [vmem:[%s408_s1 + $0x70] sm:$0xff]  ;;  %v125_v52 = vld [vmem:[%s410_s2] sm:$0x3] }
   0xc   :  { %v269_v45 = vpack.c.bf16 %v53_v43, %v52_v42  ;;  %v37_v47 = vld [vmem:[%s408_s1 + $0x78] sm:$0xff]  ;;  %v130_v54 = vrot.slane %v125_v52, %v129_v51  ;;  %v134_v56 = vrot.slane %v125_v52, %v133_v53  ;;  %v156_v4 = vld [vmem:[#allocation2] sm:$0xff]  ;;  %v158_v7 = vld [vmem:[#allocation3] sm:$0xff] }
   0xd   :  { %248 = vmatpush3.bf16.xpose.msra.mxu0 %v247_v13  ;;  %v271_v48 = vpack.c.bf16 %v37_v47, %v36_v46 }
   0xe   :  { %250 = vmatprep.subr.bf16.mxu0 %v249_v14 }
  0x15   :  { %252 = vmatpush3.bf16.xpose.msra.mxu0 %v251_v20 }
  0x16   :  { %254 = vmatprep.subr.bf16.mxu0 %v253_v21 }
  0x1d   :  { %256 = vmatpush3.bf16.xpose.msra.mxu0 %v255_v26 }
  0x1e   :  { %258 = vmatprep.subr.bf16.mxu0 %v257_v27 }
  0x25   :  { %260 = vmatpush3.bf16.xpose.msra.mxu0 %v259_v32 }
  0x26   :  { %262 = vmatprep.subr.bf16.mxu0 %v261_v33 }
  0x2d   :  { %264 = vmatpush3.bf16.xpose.msra.mxu0 %v263_v38 }
  0x2e   :  { %266 = vmatprep.subr.bf16.mxu0 %v265_v39 }
  0x35   :  { %268 = vmatpush3.bf16.xpose.msra.mxu0 %v267_v44 }
  0x36   :  { %270 = vmatprep.subr.bf16.mxu0 %v269_v45 }
  0x3d   :  { %272 = vmatpush3.bf16.xpose.msra.mxu0 %v271_v48 }
  0x44   :  { %240 = vmatmul.mubr.f32.vlgmr.msra.gmra.mrb[0].mxu0 %v21_v15 }
 0x117   :  { %v120_v57 = vpop.f32.mrb[0].mxu0 }
 0x118   :  { %v137_v58 = vsub.f32 %v130_v54, %v120_v57  ;;  %v122_v59 = vpop.f32.mrb[1].mxu0 }
 0x119   :  { %v138_v61 = vsub.f32 %v134_v56, %v122_v59 }
 0x11b   :  { %vm145_vm0 = vcmp.le.f32.partialorder %v137_v58, %v138_v61  ;;  %v139_v62 = vmin.f32 %v137_v58, %v138_v61 }
 0x11c   :  { %v146_v63 = vsel %vm145_vm0, %v137_v58, %v138_v61  ;;  %v147_v0 = vsel %vm145_vm0, %v143_v55, %v144_v60 }
 0x11d   :  { %148 = vmin.index.xlane.f32.xlu0 %v146_v63 }
 0x121   :  { %140 = vmin.xlane.f32.xlu0 %v139_v62 }
 0x1aa   :  { %v149_v3 = vpop.xlane.xlu0 %148 }
 0x1ab   :  { %276 = vset.pattern.permute.xlu0 %v149_v3  ;;  %275 = vset.pattern.permute.xlu1 %v149_v3 }
 0x1ae   :  { %v141_v5 = vpop.xlane.xlu0 %140 }
 0x1af   :  { %vm157_vm2 = vcmp.lt.f32.partialorder %v141_v5, %v156_v4  ;;  %v163_v6 = vmin.f32 %v141_v5, %v156_v4  ;;  %151 = vperm.xlu1 %275, %v147_v0  }
 0x1b1   :  { %164 = vst.msk [vmem:[#allocation2] sm:$0xff] %vm18_vm1, %v163_v6 }
 0x22e   :  { %v152_v8 = vpop.permute.xlu1 %151 }
 0x22f   :  { %v159_v9 = vsel %vm157_vm2, %v152_v8, %v158_v7 }
 0x230   :  { %161 = vst.msk [vmem:[#allocation3] sm:$0xff] %vm18_vm1, %v159_v9 }
 0x237   :  { %v168_v10 = vld [vmem:[#allocation3] sm:$0xff] }
 0x238   :  { %169 = vxpose.xlu1.b32.start.end [1/1] (short) (narrow) %v168_v10, 8 }
 0x2b8   :  { %v185_v11 = vpop.trf.xlu1 }
 0x2b9   :  { %202 = vst.msk [vmem:[%s411_s3] sm:$0x1] %vm201_vm3, %v185_v11 }

</bundles_post_ra>
